<compile_context>
chip_gen: v5e
topology: v5e:2x2
jax: 0.10.0
libtpu: 0.0.40
codegen_flags: <defaults>
</compile_context>

<pallas_src>
import functools

import jax
import jax.numpy as jnp
from jax.experimental import pallas as pl
from jax.experimental.pallas import tpu as pltpu


def _rmsnorm_kernel(x_ref, w_ref, o_ref, *, eps):
    # x_ref: (block_rows, H) activation tile; w_ref: (1, H) fp32 weight row.
    x = x_ref[...]
    x32 = x.astype(jnp.float32)                            # .to(torch.float32)
    var = jnp.mean(x32 * x32, axis=-1, keepdims=True)      # pow(2).mean(-1, keepdim=True)
    inv = jax.lax.rsqrt(var + eps)                         # rsqrt(variance + eps), EUP
    normed32 = x32 * inv
    if x.dtype != jnp.float32:
        # PyTorch: weight * hidden_states.to(input_dtype)  -> keep the round
        # trip through the input dtype so bf16 inputs match reference numerics.
        normed32 = normed32.astype(x.dtype).astype(jnp.float32)
    o_ref[...] = (w_ref[...] * normed32).astype(o_ref.dtype)


def _pick_block_rows(rows, hidden, in_dtype, out_dtype):
    """Row-tile heuristic for an HBM-bound kernel: as big as possible while
    (2x input + 2x output double buffers + ~2 fp32 intermediates) stays around
    <= 24 MiB, so it also fits v7x's 64 MiB VMEM per TensorCore."""
    in_b = jnp.dtype(in_dtype).itemsize
    out_b = jnp.dtype(out_dtype).itemsize
    per_row_bytes = hidden * (2 * in_b + 2 * out_b + 2 * 4)
    budget = 24 * 1024 * 1024
    target = max(8, budget // max(per_row_bytes, 1))
    target = min(int(target), 1024, max(rows, 1))
    # Multiple of the sublane packing for the input dtype (8 fp32, 16 bf16,
    # 32 int8/fp8) to avoid masked partial-store paths and layout repacking.
    pack = max(8, 32 // in_b)
    if target >= pack:
        target = (target // pack) * pack
    else:
        target = max(8, (target // 8) * 8)
    return int(max(8, target))


def llama_rmsnorm(hidden_states, weight, eps=1e-6, *, block_rows=None):
    """hidden_states: (..., hidden); weight: (hidden,). Matches LlamaRMSNorm.forward."""
    orig_shape = hidden_states.shape
    hidden = orig_shape[-1]
    x2d = hidden_states.reshape(-1, hidden)
    rows = x2d.shape[0]

    # PyTorch output dtype: promotion of (fp32) weight with the input-dtype
    # activation (fp32 for fp32 inputs, fp32 for bf16 inputs too).
    out_dtype = jnp.promote_types(weight.dtype, hidden_states.dtype)

    if block_rows is None:
        block_rows = _pick_block_rows(rows, hidden, x2d.dtype, out_dtype)

    # Pad rows to a multiple of block_rows; rows are independent and padded rows
    # (zeros) produce finite garbage that is sliced off afterwards.
    rows_padded = pl.cdiv(rows, block_rows) * block_rows
    if rows_padded != rows:
        x2d = jnp.pad(x2d, ((0, rows_padded - rows), (0, 0)))

    # Pre-cast the weight to fp32 once; the constant index_map keeps the (1, H)
    # block VMEM-resident across the whole grid (no re-DMA, no per-step cast).
    w2d = weight.astype(jnp.float32).reshape(1, hidden)

    grid = (rows_padded // block_rows,)

    out = pl.pallas_call(
        functools.partial(_rmsnorm_kernel, eps=eps),
        out_shape=jax.ShapeDtypeStruct((rows_padded, hidden), out_dtype),
        grid_spec=pltpu.PrefetchScalarGridSpec(
            num_scalar_prefetch=0,
            grid=grid,
            in_specs=[
                pl.BlockSpec((block_rows, hidden), lambda i: (i, 0)),
                pl.BlockSpec((1, hidden), lambda i: (0, 0)),
            ],
            out_specs=pl.BlockSpec((block_rows, hidden), lambda i: (i, 0)),
        ),
        compiler_params=pltpu.CompilerParams(
            # Row tiles are independent: "parallel" lets v7x shard the grid
            # across its 2 TensorCores; harmless on v5e/v6e.
            dimension_semantics=("parallel",),
            # Accept the large double-buffered tiles (v5e's default scoped
            # limit is 16 MiB); 48 MiB leaves headroom on v7x's 64 MiB VMEM.
            vmem_limit_bytes=48 * 1024 * 1024,
        ),
    )(x2d, w2d)

    if rows_padded != rows:
        out = out[:rows]
    return out.reshape(orig_shape[:-1] + (hidden,))


def _reference(hidden_states, weight, eps=1e-6):
    input_dtype = hidden_states.dtype
    h32 = hidden_states.astype(jnp.float32)
    var = jnp.mean(h32 * h32, axis=-1, keepdims=True)
    h32 = h32 * jax.lax.rsqrt(var + eps)
    return weight * h32.astype(input_dtype)


if __name__ == "__main__":
    key = jax.random.PRNGKey(0)
    batch, seq, hidden = 2, 8, 128
    x = jax.random.normal(key, (batch, seq, hidden), dtype=jnp.float32)
    # nn.Parameter(torch.ones(hidden_size)) — deterministic init
    weight = jnp.ones((hidden,), dtype=jnp.float32)

    out = llama_rmsnorm(x, weight, eps=1e-6)
    out = jax.block_until_ready(out)

    ref = _reference(x, weight, eps=1e-6)
    assert out.shape == ref.shape and out.dtype == ref.dtype
    assert jnp.allclose(out, ref, atol=1e-5, rtol=1e-5)

    print("KERNEL_OK")
</pallas_src>

<mosaic_0001>
module attributes {stable_mosaic.version = 11 : i64} {
  func.func @_rmsnorm_kernel(%arg0: i32, %arg1: memref<16x128xf32, #tpu.memory_space<vmem>>, %arg2: memref<1x128xf32, #tpu.memory_space<vmem>>, %arg3: memref<16x128xf32, #tpu.memory_space<vmem>>) attributes {dimension_semantics = [#tpu.dimension_semantics<parallel>], iteration_bounds = array<i64: 1>, scalar_prefetch = 0 : i64, scratch_operands = 0 : i64, tpu.core_type = #tpu.core_type<tc>, window_params = [{transform_indices = @transform_0, window_bounds = array<i64: 16, 128>}, {pipeline_mode = #tpu.pipeline_mode<synchronous>, transform_indices = @transform_1, window_bounds = array<i64: 1, 128>}, {transform_indices = @transform_2, window_bounds = array<i64: 16, 128>}]} {
    %c0 = arith.constant 0 : index
    %c0_0 = arith.constant 0 : index
    %0 = vector.load %arg1[%c0, %c0_0] : memref<16x128xf32, #tpu.memory_space<vmem>>, vector<16x128xf32>
    %1 = arith.mulf %0, %0 : vector<16x128xf32>
    %cst = arith.constant dense<0.000000e+00> : vector<16xf32>
    %2 = vector.multi_reduction <add>, %1, %cst [1] : vector<16x128xf32> to vector<16xf32>
    %3 = vector.shape_cast %2 : vector<16xf32> to vector<16x1xf32>
    %cst_1 = arith.constant 1.280000e+02 : f32
    %4 = vector.broadcast %cst_1 : f32 to vector<16x1xf32>
    %5 = arith.divf %3, %4 : vector<16x1xf32>
    %cst_2 = arith.constant 9.99999997E-7 : f32
    %6 = vector.broadcast %cst_2 : f32 to vector<16x1xf32>
    %7 = arith.addf %5, %6 : vector<16x1xf32>
    %8 = math.rsqrt %7 : vector<16x1xf32>
    %9 = vector.broadcast %8 : vector<16x1xf32> to vector<16x128xf32>
    %10 = arith.mulf %0, %9 : vector<16x128xf32>
    %c0_3 = arith.constant 0 : index
    %c0_4 = arith.constant 0 : index
    %11 = vector.load %arg2[%c0_3, %c0_4] : memref<1x128xf32, #tpu.memory_space<vmem>>, vector<1x128xf32>
    %12 = vector.broadcast %11 : vector<1x128xf32> to vector<16x128xf32>
    %13 = arith.mulf %12, %10 : vector<16x128xf32>
    %c0_5 = arith.constant 0 : index
    %c0_6 = arith.constant 0 : index
    %14 = vector.load %arg3[%c0_5, %c0_6] : memref<16x128xf32, #tpu.memory_space<vmem>>, vector<16x128xf32>
    tpu.vector_store %arg3[%c0_5, %c0_6], %13 {strides = array<i32>} : memref<16x128xf32, #tpu.memory_space<vmem>>, vector<16x128xf32>,
    return
  }
  func.func @transform_0(%arg0: i32) -> (i32, i32) {
    %c0_i32 = arith.constant 0 : i32
    %c0_i32_0 = arith.constant 0 : i32
    return %arg0, %c0_i32 : i32, i32
  }
  func.func @transform_1(%arg0: i32) -> (i32, i32) {
    %c0_i32 = arith.constant 0 : i32
    %c0_i32_0 = arith.constant 0 : i32
    %c0_i32_1 = arith.constant 0 : i32
    return %c0_i32, %c0_i32_0 : i32, i32
  }
  func.func @transform_2(%arg0: i32) -> (i32, i32) {
    %c0_i32 = arith.constant 0 : i32
    %c0_i32_0 = arith.constant 0 : i32
    return %arg0, %c0_i32 : i32, i32
  }
}

</mosaic_0001>

<bundles_post_ra>
// kernel: tpu_custom_call.1
= control target key start
LH: loop header
LB: loop body
LE: loop exit
PB: predicated region body
PF: predicated region fallthrough
CT: control target
= control target key end

     0   :  { %7 = vsyncpa [#allocation3], 0  ;;  %s238_s0 = inlined_call_operand.hbm [shape: f32[16,128], index: 0, kind: input, shape index: {}]   ;;  %s239_s1 = inlined_call_operand.hbm [shape: f32[1,128], index: 1, kind: input, shape index: {}]   ;;  %s240_s2 = inlined_call_operand.hbm [shape: f32[16,128], index: 2, kind: output, shape index: {}]  }
   0x1   :  { %8 = vsyncpa [#allocation6], 0 }
   0x2   :  { %9 = vsyncpa [#allocation4], 0  ;;  %s14_s11 = sshll.u32 %s238_s0, 4  ;;  %s202_s12 = smov [#allocation2]   ;;  %s15_s11 = int_to_ptr.hbm [resolvable:$true] %s14_s11 }
   0x3   :  { %s16_s13 = sshll.u32 %s202_s12, 4  ;;  %s28_s16 = sshll.u32 %s239_s1, 4  ;;  %s17_s13 = int_to_ptr.vmem [resolvable:$true] %s16_s13  ;;  %s29_s16 = int_to_ptr.hbm [resolvable:$true] %s28_s16 }
   0x4   :  { %s203_s17 = smov 128   ;;  %s204_s18 = smov 8  }
   0x5   :  { %22 = dma.hbm_to_vmem [thread:$0]  %s15_s11, 256, %s17_s13, [#allocation3], %s203_s17, %s203_s17, %s204_s18  }
   0x6   :  { %s205_s19 = smov [#allocation5]  }
   0x7   :  { %s30_s20 = sshll.u32 %s205_s19, 4  ;;  %s31_s20 = int_to_ptr.vmem [resolvable:$true] %s30_s20 }
   0x8   :  { %33 = dma.hbm_to_vmem [thread:$0]  %s29_s16, 16, %s31_s20, [#allocation6]  }
   0x9   :  { %196 = dma.done.wait [#allocation3], 256  }
   0xa   :  { %197 = vsyncadd [#allocation3], 4294967040 }
   0xb   :  { %198 = dma.done.wait [#allocation6], 16  }
   0xc   :  { %199 = vsyncadd [#allocation6], 4294967280  ;;  %v42_v0 = vld [vmem:[#allocation2] sm:$0xff]  ;;  %v43_v2 = vld [vmem:[#allocation2 + $0x8] sm:$0xff]  ;;  %v206_v4 = vmov 128.0   ;;  %s207_s0 = smov [#allocation7]  }
   0xd   :  { %v44_v1 = vmul.f32 %v42_v0, %v42_v0  ;;  %v45_v3 = vmul.f32 %v43_v2, %v43_v2  ;;  %118 = vrcp.f32 %v206_v4  ;;  %v117_v25 = vld [vmem:[#allocation5] ss:$0 sm:$0xff]  ;;  %s95_s1 = sshll.u32 %s207_s0, 4  ;;  %s97_s23 = sshll.u32 %s240_s2, 4  ;;  %s96_s1 = int_to_ptr.vmem [resolvable:$true] %s95_s1  ;;  %s98_s23 = int_to_ptr.hbm [resolvable:$true] %s97_s23 }
   0xf   :  { %46 = vadd.xlane.f32.xlu0 %v44_v1 }
  0x13   :  { %v119_v5 = vpop.eup %118 }
  0x14   :  { %v51_v6 = vmul.f32 128.0, %v119_v5  ;;  %vm55_vm0 = vweird.f32 %v119_v5 }
  0x16   :  { %v52_v7 = vsub.f32 1.0, %v51_v6 }
  0x17   :  { %48 = vadd.xlane.f32.xlu0 %v45_v3 }
  0x18   :  { %v53_v8 = vmul.f32 %v119_v5, %v52_v7 }
  0x1a   :  { %v54_v9 = vadd.f32 %v119_v5, %v53_v8 }
  0x1c   :  { %v56_v10 = vsel %vm55_vm0, %v119_v5, %v54_v9 }
  0x82   :  { %v47_v11 = vpop.xlane.xlu0 %46 }
  0x83   :  { %v57_v12 = vmul.f32 %v56_v10, %v47_v11 }
  0x85   :  { %v59_v13 = vadd.f32 1e-06, %v57_v12 }
  0x87   :  { %120 = vrsqrt.f32 %v59_v13  ;;  %vm67_vm2 = vweird.f32 %v59_v13 }
  0x8a   :  { %v49_v14 = vpop.xlane.xlu0 %48 }
  0x8b   :  { %v58_v15 = vmul.f32 %v56_v10, %v49_v14 }
  0x8d   :  { %v121_v16 = vpop.eup %120  ;;  %v60_v17 = vadd.f32 1e-06, %v58_v15 }
  0x8e   :  { %v62_v18 = vmul.f32 %v121_v16, %v59_v13  ;;  %vm68_vm1 = vweird.f32 %v121_v16 }
  0x8f   :  { %122 = vrsqrt.f32 %v60_v17  ;;  %vm69_vm3 = vmor %vm67_vm2, %vm68_vm1  ;;  %vm77_vm5 = vweird.f32 %v60_v17 }
  0x90   :  { %v63_v19 = vmul.f32 %v121_v16, %v62_v18 }
  0x92   :  { %v64_v20 = vmul.f32 0.5, %v63_v19 }
  0x94   :  { %v65_v21 = vsub.f32 1.5, %v64_v20 }
  0x95   :  { %v123_v22 = vpop.eup %122 }
  0x96   :  { %v66_v23 = vmul.f32 %v121_v16, %v65_v21  ;;  %v72_v24 = vmul.f32 %v123_v22, %v60_v17  ;;  %vm78_vm4 = vweird.f32 %v123_v22 }
  0x97   :  { %vm79_vm6 = vmor %vm77_vm5, %vm78_vm4 }
  0x98   :  { %v70_v26 = vsel %vm69_vm3, %v121_v16, %v66_v23  ;;  %v73_v27 = vmul.f32 %v123_v22, %v72_v24 }
  0x99   :  { %v81_v28 = vmul.f32 %v70_v26, %v42_v0 }
  0x9a   :  { %v74_v29 = vmul.f32 0.5, %v73_v27 }
  0x9b   :  { %v87_v30 = vmul.f32 %v117_v25, %v81_v28 }
  0x9c   :  { %v75_v31 = vsub.f32 1.5, %v74_v29 }
  0x9d   :  { %89 = vst [vmem:[#allocation7] sm:$0xff] %v87_v30 }
  0x9e   :  { %v76_v32 = vmul.f32 %v123_v22, %v75_v31 }
  0xa0   :  { %v80_v33 = vsel %vm79_vm6, %v123_v22, %v76_v32 }
  0xa1   :  { %v82_v34 = vmul.f32 %v80_v33, %v43_v2 }
  0xa3   :  { %v88_v35 = vmul.f32 %v117_v25, %v82_v34 }
  0xa5   :  { %90 = vst [vmem:[#allocation7 + $0x8] sm:$0xff] %v88_v35 }
  0xa6   :  { %103 = dma.vmem_to_hbm [thread:$0]  %s96_s1, 256, %s98_s23, [#allocation4], %s203_s17, %s203_s17, %s204_s18  }
  0xa7   :  { %200 = dma.done.wait [#allocation4], 256  }
  0xa8   :  { %201 = vsyncadd [#allocation4], 4294967040 }
  0xa9   :  { %108 = vsyncpa [#allocation3], 1 }
  0xaa   :  { %109 = vsyncpa [#allocation6], 1 }
  0xab   :  { %110 = vsyncpa [#allocation4], 1 }

</bundles_post_ra>
